<compile_context>
chip_gen: v7x
topology: tpu7x:2x2x1
jax: 0.10.0
libtpu: 0.0.40
codegen_flags: <defaults>
</compile_context>

<pallas_src>
import math
import functools

import jax
import jax.numpy as jnp
from jax import lax
from jax.experimental import pallas as pl
from jax.experimental.pallas import tpu as pltpu

_LN_EPS = 1e-5  # torch.nn.LayerNorm default


def _gelu_exact(x):
    # Exact GELU: 0.5 * x * (1 + erf(x / sqrt(2)))  (torch.nn.GELU default)
    return 0.5 * x * (1.0 + lax.erf(x * (1.0 / math.sqrt(2.0))))


def _layernorm_f32(x, gamma, beta, eps):
    mu = jnp.mean(x, axis=-1, keepdims=True)
    xc = x - mu
    var = jnp.mean(xc * xc, axis=-1, keepdims=True)
    return (xc * lax.rsqrt(var + eps)) * gamma + beta


def _vmem_limit_bytes(*parts):
    need = int(sum(parts))
    return int(min(max(2 * need, 32 * 1024 * 1024), 64 * 1024 * 1024))


def _pick_hidden_chunk(H):
    # Chunk the 4*C hidden dim for large models so the (tm, th) f32 GELU
    # intermediate stays bounded (vreg/VMEM pressure).
    for th in (2048, 1024):
        if H > th and H % th == 0:
            return th, H // th
    return H, 1


# --------------------------------------------------------------------------
# Kernel 1: ln_1 + causal self-attention + output projection + residual
# --------------------------------------------------------------------------
def attn_block_kernel(x_ref, ln_g_ref, ln_b_ref, w_qkv_ref, b_qkv_ref,
                      w_o_ref, b_o_ref, o_ref, qkv_scr, y_scr,
                      *, n_head, scale, ln_eps):
    x = x_ref[...].astype(jnp.float32)                       # (T, C)
    T, C = x.shape
    hd = C // n_head

    # --- ln_1 (f32) ---
    xn = _layernorm_f32(x, ln_g_ref[...], ln_b_ref[...], ln_eps)

    # --- fused QKV projection: bf16 operands, f32 accumulation ---
    qkv_scr[...] = (
        jnp.dot(xn.astype(w_qkv_ref.dtype), w_qkv_ref[...],
                preferred_element_type=jnp.float32) + b_qkv_ref[...])

    # Shared causal mask.
    row = lax.broadcasted_iota(jnp.int32, (T, T), 0)
    col = lax.broadcasted_iota(jnp.int32, (T, T), 1)
    causal = col <= row

    # --- per-head attention (softmax in f32) ---
    for h in range(n_head):
        q = qkv_scr[:, h * hd:(h + 1) * hd].astype(jnp.bfloat16)
        k = qkv_scr[:, C + h * hd:C + (h + 1) * hd].astype(jnp.bfloat16)
        v = qkv_scr[:, 2 * C + h * hd:2 * C + (h + 1) * hd].astype(jnp.bfloat16)

        s = lax.dot_general(q, k, (((1,), (1,)), ((), ())),     # q @ k^T
                            preferred_element_type=jnp.float32) * scale
        s = jnp.where(causal, s, -1e30)
        m = jnp.max(s, axis=-1, keepdims=True)
        p = jnp.exp(s - m)
        p = p / jnp.sum(p, axis=-1, keepdims=True)

        y_scr[:, h * hd:(h + 1) * hd] = jnp.dot(
            p.astype(jnp.bfloat16), v, preferred_element_type=jnp.float32)

    # --- output projection + residual add (f32) ---
    y = (jnp.dot(y_scr[...].astype(w_o_ref.dtype), w_o_ref[...],
                 preferred_element_type=jnp.float32) + b_o_ref[...])
    # attn_dropout / resid_dropout are identity at inference (p = 0.0).
    o_ref[...] = (x + y).astype(o_ref.dtype)


# --------------------------------------------------------------------------
# Kernel 2: ln_2 + MLP (c_fc -> GELU -> c_proj) + residual
# --------------------------------------------------------------------------
def mlp_block_kernel(x_ref, ln_g_ref, ln_b_ref, w_fc_ref, b_fc_ref,
                     w_pr_ref, b_pr_ref, o_ref, *, ln_eps, th, n_chunks):
    x = x_ref[...].astype(jnp.float32)                        # (tm, C)

    # --- ln_2 (f32) ---
    xn = _layernorm_f32(x, ln_g_ref[...], ln_b_ref[...], ln_eps)
    xn = xn.astype(w_fc_ref.dtype)                            # bf16 MXU operand

    # Residual + c_proj bias folded into the accumulator init (f32).
    acc = x + b_pr_ref[...]

    # Hidden dim processed in chunks: per-chunk fc matmul, GELU, proj matmul.
    for j in range(n_chunks):
        lo, hi = j * th, (j + 1) * th
        h = jnp.dot(xn, w_fc_ref[:, lo:hi],
                    preferred_element_type=jnp.float32) + b_fc_ref[:, lo:hi]
        h = _gelu_exact(h)                                    # exact GELU, f32
        acc = acc + jnp.dot(h.astype(w_pr_ref.dtype), w_pr_ref[lo:hi, :],
                            preferred_element_type=jnp.float32)

    # MLP dropout is identity at inference (p = 0.0).
    o_ref[...] = acc.astype(o_ref.dtype)


# --------------------------------------------------------------------------
# Wrapper: full Block forward
# --------------------------------------------------------------------------
@functools.partial(jax.jit, static_argnames=("n_head", "tm"))
def block_forward(x,
                  ln1_g, ln1_b,
                  w_qkv, b_qkv, w_attn_proj, b_attn_proj,
                  ln2_g, ln2_b,
                  w_fc, b_fc, w_proj, b_proj,
                  *, n_head, tm=256):
    B, T, C = x.shape
    assert C % n_head == 0
    hd = C // n_head
    H = w_fc.shape[1]
    f32, bf16 = jnp.float32, jnp.bfloat16

    # Param prep: bf16 weights (MXU operands), f32 biases / LN params as 2-D rows.
    ln1_g2 = ln1_g.reshape(1, C).astype(f32)
    ln1_b2 = ln1_b.reshape(1, C).astype(f32)
    ln2_g2 = ln2_g.reshape(1, C).astype(f32)
    ln2_b2 = ln2_b.reshape(1, C).astype(f32)
    w_qkv16 = w_qkv.astype(bf16)
    w_o16 = w_attn_proj.astype(bf16)
    w_fc16 = w_fc.astype(bf16)
    w_pr16 = w_proj.astype(bf16)
    b_qkv2 = b_qkv.reshape(1, 3 * C).astype(f32)
    b_o2 = b_attn_proj.reshape(1, C).astype(f32)
    b_fc2 = b_fc.reshape(1, H).astype(f32)
    b_pr2 = b_proj.reshape(1, C).astype(f32)

    # ---------------- attention kernel ----------------
    attn_cost = pl.CostEstimate(
        flops=int(2 * B * T * C * 3 * C + 2 * B * T * C * C
                  + 4 * B * n_head * T * T * hd),
        transcendentals=int(B * n_head * T * T),
        bytes_accessed=int(2 * B * T * C * 4 + (3 * C * C + C * C) * 2
                           + 8 * C * 4),
    )
    attn_vmem = _vmem_limit_bytes(
        2 * 2 * T * C * 4,              # x in + out tiles, double buffered
        2 * (3 * C * C + C * C) * 2,    # qkv + proj weights (bf16), 2 buffers
        8 * C * 4,                      # biases + LN params
        T * 4 * C * 4,                  # qkv + y scratch
    )

    x_attn = pl.pallas_call(
        functools.partial(attn_block_kernel, n_head=n_head,
                          scale=1.0 / math.sqrt(hd), ln_eps=_LN_EPS),
        out_shape=jax.ShapeDtypeStruct((B, T, C), x.dtype),
        grid_spec=pltpu.PrefetchScalarGridSpec(
            num_scalar_prefetch=0,
            grid=(B,),
            in_specs=[
                pl.BlockSpec((None, T, C), lambda b: (b, 0, 0)),   # x (one batch)
                pl.BlockSpec((1, C), lambda b: (0, 0)),            # ln_1 weight
                pl.BlockSpec((1, C), lambda b: (0, 0)),            # ln_1 bias
                pl.BlockSpec((C, 3 * C), lambda b: (0, 0)),        # c_attn weight
                pl.BlockSpec((1, 3 * C), lambda b: (0, 0)),        # c_attn bias
                pl.BlockSpec((C, C), lambda b: (0, 0)),            # attn c_proj W
                pl.BlockSpec((1, C), lambda b: (0, 0)),            # attn c_proj b
            ],
            out_specs=pl.BlockSpec((None, T, C), lambda b: (b, 0, 0)),
            scratch_shapes=[pltpu.VMEM((T, 3 * C), jnp.float32),   # qkv
                            pltpu.VMEM((T, C), jnp.float32)],      # head outputs
        ),
        compiler_params=pltpu.CompilerParams(
            dimension_semantics=("parallel",),
            vmem_limit_bytes=attn_vmem),
        cost_estimate=attn_cost,
    )(x, ln1_g2, ln1_b2, w_qkv16, b_qkv2, w_o16, b_o2)

    # ---------------- MLP kernel ----------------
    M = B * T
    tm_eff = min(tm, M)
    if tm_eff < M:
        tm_eff = max(8, (tm_eff // 8) * 8)    # sublane-aligned row tile
    th, n_chunks = _pick_hidden_chunk(H)

    mlp_cost = pl.CostEstimate(
        flops=int(4 * M * C * H),
        transcendentals=int(M * H),
        bytes_accessed=int(2 * M * C * 4 + 2 * C * H * 2 + (H + 3 * C) * 4),
    )
    mlp_vmem = _vmem_limit_bytes(
        2 * 2 * tm_eff * C * 4,          # x in + out tiles, double buffered
        2 * 2 * C * H * 2,               # c_fc + c_proj weights (bf16), 2 buffers
        2 * (H + 3 * C) * 4,             # biases + LN params
        tm_eff * th * 4,                 # f32 GELU intermediate chunk
    )

    out = pl.pallas_call(
        functools.partial(mlp_block_kernel, ln_eps=_LN_EPS,
                          th=th, n_chunks=n_chunks),
        out_shape=jax.ShapeDtypeStruct((M, C), x.dtype),
        grid_spec=pltpu.PrefetchScalarGridSpec(
            num_scalar_prefetch=0,
            grid=(pl.cdiv(M, tm_eff),),
            in_specs=[
                pl.BlockSpec((tm_eff, C), lambda i: (i, 0)),  # activations tile
                pl.BlockSpec((1, C), lambda i: (0, 0)),       # ln_2 weight
                pl.BlockSpec((1, C), lambda i: (0, 0)),       # ln_2 bias
                pl.BlockSpec((C, H), lambda i: (0, 0)),       # c_fc weight
                pl.BlockSpec((1, H), lambda i: (0, 0)),       # c_fc bias
                pl.BlockSpec((H, C), lambda i: (0, 0)),       # c_proj weight
                pl.BlockSpec((1, C), lambda i: (0, 0)),       # c_proj bias
            ],
            out_specs=pl.BlockSpec((tm_eff, C), lambda i: (i, 0)),
        ),
        compiler_params=pltpu.CompilerParams(
            dimension_semantics=("parallel",),
            vmem_limit_bytes=mlp_vmem),
        cost_estimate=mlp_cost,
    )(x_attn.reshape(M, C), ln2_g2, ln2_b2, w_fc16, b_fc2, w_pr16, b_pr2)

    # Block.forward returns (x, present); present is None for use_cache=False.
    return out.reshape(B, T, C)


# --------------------------------------------------------------------------
# Pure-JAX f32 reference (mirrors the PyTorch Block at inference)
# --------------------------------------------------------------------------
def reference_block(x, ln1_g, ln1_b, w_qkv, b_qkv, w_o, b_o,
                    ln2_g, ln2_b, w_fc, b_fc, w_pr, b_pr, n_head):
    def ln(v, g, b):
        mu = v.mean(-1, keepdims=True)
        var = ((v - mu) ** 2).mean(-1, keepdims=True)
        return (v - mu) / jnp.sqrt(var + _LN_EPS) * g + b

    B, T, C = x.shape
    hd = C // n_head
    h1 = ln(x, ln1_g, ln1_b)
    qkv = h1 @ w_qkv + b_qkv
    q, k, v = jnp.split(qkv, 3, axis=-1)
    q = q.reshape(B, T, n_head, hd).transpose(0, 2, 1, 3)
    k = k.reshape(B, T, n_head, hd).transpose(0, 2, 1, 3)
    v = v.reshape(B, T, n_head, hd).transpose(0, 2, 1, 3)
    s = jnp.einsum("bhqd,bhkd->bhqk", q, k) / math.sqrt(hd)
    mask = jnp.tril(jnp.ones((T, T), bool))
    s = jnp.where(mask, s, -1e30)
    p = jax.nn.softmax(s, axis=-1)
    y = jnp.einsum("bhqk,bhkd->bhqd", p, v).transpose(0, 2, 1, 3).reshape(B, T, C)
    y = y @ w_o + b_o
    x = x + y
    h2 = ln(x, ln2_g, ln2_b)
    m = h2 @ w_fc + b_fc
    m = _gelu_exact(m)
    m = m @ w_pr + b_pr
    return x + m


if __name__ == "__main__":
    # Small config consistent with the module: n_embd=32, n_head=4, bias=True,
    # dropout=0.0, B=2, T=8.
    B, T, C, n_head = 2, 8, 32, 4
    H = 4 * C

    key = jax.random.PRNGKey(0)
    ks = jax.random.split(key, 13)
    x = jax.random.normal(ks[0], (B, T, C), dtype=jnp.float32)
    ln1_g = 1.0 + 0.1 * jax.random.normal(ks[1], (C,), jnp.float32)
    ln1_b = 0.1 * jax.random.normal(ks[2], (C,), jnp.float32)
    w_qkv = 0.02 * jax.random.normal(ks[3], (C, 3 * C), jnp.float32)
    b_qkv = 0.02 * jax.random.normal(ks[4], (3 * C,), jnp.float32)
    w_o = 0.02 * jax.random.normal(ks[5], (C, C), jnp.float32)
    b_o = 0.02 * jax.random.normal(ks[6], (C,), jnp.float32)
    ln2_g = 1.0 + 0.1 * jax.random.normal(ks[7], (C,), jnp.float32)
    ln2_b = 0.1 * jax.random.normal(ks[8], (C,), jnp.float32)
    w_fc = 0.02 * jax.random.normal(ks[9], (C, H), jnp.float32)
    b_fc = 0.02 * jax.random.normal(ks[10], (H,), jnp.float32)
    w_pr = 0.02 * jax.random.normal(ks[11], (H, C), jnp.float32)
    b_pr = 0.02 * jax.random.normal(ks[12], (C,), jnp.float32)

    out = block_forward(x, ln1_g, ln1_b, w_qkv, b_qkv, w_o, b_o,
                        ln2_g, ln2_b, w_fc, b_fc, w_pr, b_pr,
                        n_head=n_head, tm=256)
    out = jax.block_until_ready(out)

    ref = reference_block(x, ln1_g, ln1_b, w_qkv, b_qkv, w_o, b_o,
                          ln2_g, ln2_b, w_fc, b_fc, w_pr, b_pr, n_head)

    assert out.shape == (B, T, C)
    # Kernel runs matmuls with bf16 operands (f32 accumulate); compare against
    # the f32 reference with a tolerance sized for bf16 operand rounding.
    assert jnp.allclose(out, ref, atol=2e-2, rtol=2e-2), "mismatch vs JAX reference"

    print("KERNEL_OK")
</pallas_src>

<mosaic_0001>
module attributes {stable_mosaic.version = 11 : i64} {
  func.func @attn_block_kernel(%arg0: i32, %arg1: memref<1x8x32xf32, #tpu.memory_space<vmem>>, %arg2: memref<1x32xf32, #tpu.memory_space<vmem>>, %arg3: memref<1x32xf32, #tpu.memory_space<vmem>>, %arg4: memref<32x96xbf16, #tpu.memory_space<vmem>>, %arg5: memref<1x96xf32, #tpu.memory_space<vmem>>, %arg6: memref<32x32xbf16, #tpu.memory_space<vmem>>, %arg7: memref<1x32xf32, #tpu.memory_space<vmem>>, %arg8: memref<1x8x32xf32, #tpu.memory_space<vmem>>, %arg9: memref<8x96xf32, #tpu.memory_space<vmem>>, %arg10: memref<8x32xf32, #tpu.memory_space<vmem>>) attributes {dimension_semantics = [#tpu.dimension_semantics<parallel>], iteration_bounds = array<i64: 2>, scalar_prefetch = 0 : i64, scratch_operands = 2 : i64, tpu.core_type = #tpu.core_type<tc>, window_params = [{transform_indices = @transform_0, window_bounds = array<i64: 1, 8, 32>}, {pipeline_mode = #tpu.pipeline_mode<synchronous>, transform_indices = @transform_1, window_bounds = array<i64: 1, 32>}, {pipeline_mode = #tpu.pipeline_mode<synchronous>, transform_indices = @transform_2, window_bounds = array<i64: 1, 32>}, {pipeline_mode = #tpu.pipeline_mode<synchronous>, transform_indices = @transform_3, window_bounds = array<i64: 32, 96>}, {pipeline_mode = #tpu.pipeline_mode<synchronous>, transform_indices = @transform_4, window_bounds = array<i64: 1, 96>}, {pipeline_mode = #tpu.pipeline_mode<synchronous>, transform_indices = @transform_5, window_bounds = array<i64: 32, 32>}, {pipeline_mode = #tpu.pipeline_mode<synchronous>, transform_indices = @transform_6, window_bounds = array<i64: 1, 32>}, {transform_indices = @transform_7, window_bounds = array<i64: 1, 8, 32>}]} {
    %c0 = arith.constant 0 : index
    %c0_0 = arith.constant 0 : index
    %c0_1 = arith.constant 0 : index
    %0 = vector.load %arg1[%c0, %c0_0, %c0_1] : memref<1x8x32xf32, #tpu.memory_space<vmem>>, vector<1x8x32xf32>
    %1 = vector.shape_cast %0 : vector<1x8x32xf32> to vector<8x32xf32>
    %c0_2 = arith.constant 0 : index
    %c0_3 = arith.constant 0 : index
    %2 = vector.load %arg2[%c0_2, %c0_3] : memref<1x32xf32, #tpu.memory_space<vmem>>, vector<1x32xf32>
    %c0_4 = arith.constant 0 : index
    %c0_5 = arith.constant 0 : index
    %3 = vector.load %arg3[%c0_4, %c0_5] : memref<1x32xf32, #tpu.memory_space<vmem>>, vector<1x32xf32>
    %cst = arith.constant dense<0.000000e+00> : vector<8xf32>
    %4 = vector.multi_reduction <add>, %1, %cst [1] : vector<8x32xf32> to vector<8xf32>
    %5 = vector.shape_cast %4 : vector<8xf32> to vector<8x1xf32>
    %cst_6 = arith.constant 3.200000e+01 : f32
    %6 = vector.broadcast %cst_6 : f32 to vector<8x1xf32>
    %7 = arith.divf %5, %6 : vector<8x1xf32>
    %8 = vector.broadcast %7 : vector<8x1xf32> to vector<8x32xf32>
    %9 = arith.subf %1, %8 : vector<8x32xf32>
    %10 = arith.mulf %9, %9 : vector<8x32xf32>
    %cst_7 = arith.constant dense<0.000000e+00> : vector<8xf32>
    %11 = vector.multi_reduction <add>, %10, %cst_7 [1] : vector<8x32xf32> to vector<8xf32>
    %12 = vector.shape_cast %11 : vector<8xf32> to vector<8x1xf32>
    %cst_8 = arith.constant 3.200000e+01 : f32
    %13 = vector.broadcast %cst_8 : f32 to vector<8x1xf32>
    %14 = arith.divf %12, %13 : vector<8x1xf32>
    %cst_9 = arith.constant 9.99999974E-6 : f32
    %15 = vector.broadcast %cst_9 : f32 to vector<8x1xf32>
    %16 = arith.addf %14, %15 : vector<8x1xf32>
    %17 = math.rsqrt %16 : vector<8x1xf32>
    %18 = vector.broadcast %17 : vector<8x1xf32> to vector<8x32xf32>
    %19 = arith.mulf %9, %18 : vector<8x32xf32>
    %20 = vector.broadcast %2 : vector<1x32xf32> to vector<8x32xf32>
    %21 = arith.mulf %19, %20 : vector<8x32xf32>
    %22 = vector.broadcast %3 : vector<1x32xf32> to vector<8x32xf32>
    %23 = arith.addf %21, %22 : vector<8x32xf32>
    %24 = arith.truncf %23 : vector<8x32xf32> to vector<8x32xbf16>
    %c0_10 = arith.constant 0 : index
    %c0_11 = arith.constant 0 : index
    %25 = vector.load %arg4[%c0_10, %c0_11] : memref<32x96xbf16, #tpu.memory_space<vmem>>, vector<32x96xbf16>
    %cst_12 = arith.constant dense<0.000000e+00> : vector<8x96xf32>
    %26 = tpu.matmul %24, %25, %cst_12 {dimension_numbers = #tpu.dot_dimension_numbers<[1], [0], [0], [1], [0, 0, 1, 1], [], []>} : vector<8x32xbf16>, vector<32x96xbf16>, vector<8x96xf32> -> vector<8x96xf32>
    %c0_13 = arith.constant 0 : index
    %c0_14 = arith.constant 0 : index
    %27 = vector.load %arg5[%c0_13, %c0_14] : memref<1x96xf32, #tpu.memory_space<vmem>>, vector<1x96xf32>
    %28 = vector.broadcast %27 : vector<1x96xf32> to vector<8x96xf32>
    %29 = arith.addf %26, %28 : vector<8x96xf32>
    %c0_15 = arith.constant 0 : index
    %c0_16 = arith.constant 0 : index
    %30 = vector.load %arg9[%c0_15, %c0_16] : memref<8x96xf32, #tpu.memory_space<vmem>>, vector<8x96xf32>
    tpu.vector_store %arg9[%c0_15, %c0_16], %29 {strides = array<i32>} : memref<8x96xf32, #tpu.memory_space<vmem>>, vector<8x96xf32>,
    %31 = tpu.iota {dimensions = array<i32: 0>} : vector<8x8xi32>
    %32 = tpu.iota {dimensions = array<i32: 1>} : vector<8x8xi32>
    %33 = arith.cmpi sle, %32, %31 : vector<8x8xi32>
    %c0_17 = arith.constant 0 : index
    %c0_18 = arith.constant 0 : index
    %34 = vector.load %arg9[%c0_17, %c0_18] : memref<8x96xf32, #tpu.memory_space<vmem>>, vector<8x8xf32>
    %35 = arith.truncf %34 : vector<8x8xf32> to vector<8x8xbf16>
    %c0_19 = arith.constant 0 : index
    %c32 = arith.constant 32 : index
    %36 = vector.load %arg9[%c0_19, %c32] : memref<8x96xf32, #tpu.memory_space<vmem>>, vector<8x8xf32>
    %37 = arith.truncf %36 : vector<8x8xf32> to vector<8x8xbf16>
    %c0_20 = arith.constant 0 : index
    %c64 = arith.constant 64 : index
    %38 = vector.load %arg9[%c0_20, %c64] : memref<8x96xf32, #tpu.memory_space<vmem>>, vector<8x8xf32>
    %39 = arith.truncf %38 : vector<8x8xf32> to vector<8x8xbf16>
    %cst_21 = arith.constant dense<0.000000e+00> : vector<8x8xf32>
    %40 = tpu.matmul %35, %37, %cst_21 {dimension_numbers = #tpu.dot_dimension_numbers<[1], [1], [0], [0], [0, 0, 1, 0], [], []>} : vector<8x8xbf16>, vector<8x8xbf16>, vector<8x8xf32> -> vector<8x8xf32>
    %cst_22 = arith.constant 0.353553385 : f32
    %41 = vector.broadcast %cst_22 : f32 to vector<8x8xf32>
    %42 = arith.mulf %40, %41 : vector<8x8xf32>
    %cst_23 = arith.constant -1.000000e+30 : f32
    %43 = vector.broadcast %cst_23 : f32 to vector<8x8xf32>
    %44 = arith.select %33, %42, %43 : vector<8x8xi1>, vector<8x8xf32>
    %cst_24 = arith.constant dense<0xFF800000> : vector<8xf32>
    %45 = vector.multi_reduction <maximumf>, %44, %cst_24 [1] : vector<8x8xf32> to vector<8xf32>
    %46 = vector.shape_cast %45 : vector<8xf32> to vector<8x1xf32>
    %47 = vector.broadcast %46 : vector<8x1xf32> to vector<8x8xf32>
    %48 = arith.subf %44, %47 : vector<8x8xf32>
    %49 = math.exp %48 : vector<8x8xf32>
    %cst_25 = arith.constant dense<0.000000e+00> : vector<8xf32>
    %50 = vector.multi_reduction <add>, %49, %cst_25 [1] : vector<8x8xf32> to vector<8xf32>
    %51 = vector.shape_cast %50 : vector<8xf32> to vector<8x1xf32>
    %52 = vector.broadcast %51 : vector<8x1xf32> to vector<8x8xf32>
    %53 = arith.divf %49, %52 : vector<8x8xf32>
    %54 = arith.truncf %53 : vector<8x8xf32> to vector<8x8xbf16>
    %cst_26 = arith.constant dense<0.000000e+00> : vector<8x8xf32>
    %55 = tpu.matmul %54, %39, %cst_26 {dimension_numbers = #tpu.dot_dimension_numbers<[1], [0], [0], [1], [0, 0, 1, 1], [], []>} : vector<8x8xbf16>, vector<8x8xbf16>, vector<8x8xf32> -> vector<8x8xf32>
    %c0_27 = arith.constant 0 : index
    %c0_28 = arith.constant 0 : index
    %56 = vector.load %arg10[%c0_27, %c0_28] : memref<8x32xf32, #tpu.memory_space<vmem>>, vector<8x8xf32>
    tpu.vector_store %arg10[%c0_27, %c0_28], %55 {strides = array<i32>} : memref<8x32xf32, #tpu.memory_space<vmem>>, vector<8x8xf32>,
    %c0_29 = arith.constant 0 : index
    %c8 = arith.constant 8 : index
    %57 = vector.load %arg9[%c0_29, %c8] : memref<8x96xf32, #tpu.memory_space<vmem>>, vector<8x8xf32>
    %58 = arith.truncf %57 : vector<8x8xf32> to vector<8x8xbf16>
    %c0_30 = arith.constant 0 : index
    %c40 = arith.constant 40 : index
    %59 = vector.load %arg9[%c0_30, %c40] : memref<8x96xf32, #tpu.memory_space<vmem>>, vector<8x8xf32>
    %60 = arith.truncf %59 : vector<8x8xf32> to vector<8x8xbf16>
    %c0_31 = arith.constant 0 : index
    %c72 = arith.constant 72 : index
    %61 = vector.load %arg9[%c0_31, %c72] : memref<8x96xf32, #tpu.memory_space<vmem>>, vector<8x8xf32>
    %62 = arith.truncf %61 : vector<8x8xf32> to vector<8x8xbf16>
    %cst_32 = arith.constant dense<0.000000e+00> : vector<8x8xf32>
    %63 = tpu.matmul %58, %60, %cst_32 {dimension_numbers = #tpu.dot_dimension_numbers<[1], [1], [0], [0], [0, 0, 1, 0], [], []>} : vector<8x8xbf16>, vector<8x8xbf16>, vector<8x8xf32> -> vector<8x8xf32>
    %cst_33 = arith.constant 0.353553385 : f32
    %64 = vector.broadcast %cst_33 : f32 to vector<8x8xf32>
    %65 = arith.mulf %63, %64 : vector<8x8xf32>
    %cst_34 = arith.constant -1.000000e+30 : f32
    %66 = vector.broadcast %cst_34 : f32 to vector<8x8xf32>
    %67 = arith.select %33, %65, %66 : vector<8x8xi1>, vector<8x8xf32>
    %cst_35 = arith.constant dense<0xFF800000> : vector<8xf32>
    %68 = vector.multi_reduction <maximumf>, %67, %cst_35 [1] : vector<8x8xf32> to vector<8xf32>
    %69 = vector.shape_cast %68 : vector<8xf32> to vector<8x1xf32>
    %70 = vector.broadcast %69 : vector<8x1xf32> to vector<8x8xf32>
    %71 = arith.subf %67, %70 : vector<8x8xf32>
    %72 = math.exp %71 : vector<8x8xf32>
    %cst_36 = arith.constant dense<0.000000e+00> : vector<8xf32>
    %73 = vector.multi_reduction <add>, %72, %cst_36 [1] : vector<8x8xf32> to vector<8xf32>
    %74 = vector.shape_cast %73 : vector<8xf32> to vector<8x1xf32>
    %75 = vector.broadcast %74 : vector<8x1xf32> to vector<8x8xf32>
    %76 = arith.divf %72, %75 : vector<8x8xf32>
    %77 = arith.truncf %76 : vector<8x8xf32> to vector<8x8xbf16>
    %cst_37 = arith.constant dense<0.000000e+00> : vector<8x8xf32>
    %78 = tpu.matmul %77, %62, %cst_37 {dimension_numbers = #tpu.dot_dimension_numbers<[1], [0], [0], [1], [0, 0, 1, 1], [], []>} : vector<8x8xbf16>, vector<8x8xbf16>, vector<8x8xf32> -> vector<8x8xf32>
    %c0_38 = arith.constant 0 : index
    %c8_39 = arith.constant 8 : index
    %79 = vector.load %arg10[%c0_38, %c8_39] : memref<8x32xf32, #tpu.memory_space<vmem>>, vector<8x8xf32>
    tpu.vector_store %arg10[%c0_38, %c8_39], %78 {strides = array<i32>} : memref<8x32xf32, #tpu.memory_space<vmem>>, vector<8x8xf32>,
    %c0_40 = arith.constant 0 : index
    %c16 = arith.constant 16 : index
    %80 = vector.load %arg9[%c0_40, %c16] : memref<8x96xf32, #tpu.memory_space<vmem>>, vector<8x8xf32>
    %81 = arith.truncf %80 : vector<8x8xf32> to vector<8x8xbf16>
    %c0_41 = arith.constant 0 : index
    %c48 = arith.constant 48 : index
    %82 = vector.load %arg9[%c0_41, %c48] : memref<8x96xf32, #tpu.memory_space<vmem>>, vector<8x8xf32>
    %83 = arith.truncf %82 : vector<8x8xf32> to vector<8x8xbf16>
    %c0_42 = arith.constant 0 : index
    %c80 = arith.constant 80 : index
    %84 = vector.load %arg9[%c0_42, %c80] : memref<8x96xf32, #tpu.memory_space<vmem>>, vector<8x8xf32>
    %85 = arith.truncf %84 : vector<8x8xf32> to vector<8x8xbf16>
    %cst_43 = arith.constant dense<0.000000e+00> : vector<8x8xf32>
    %86 = tpu.matmul %81, %83, %cst_43 {dimension_numbers = #tpu.dot_dimension_numbers<[1], [1], [0], [0], [0, 0, 1, 0], [], []>} : vector<8x8xbf16>, vector<8x8xbf16>, vector<8x8xf32> -> vector<8x8xf32>
    %cst_44 = arith.constant 0.353553385 : f32
    %87 = vector.broadcast %cst_44 : f32 to vector<8x8xf32>
    %88 = arith.mulf %86, %87 : vector<8x8xf32>
    %cst_45 = arith.constant -1.000000e+30 : f32
    %89 = vector.broadcast %cst_45 : f32 to vector<8x8xf32>
    %90 = arith.select %33, %88, %89 : vector<8x8xi1>, vector<8x8xf32>
    %cst_46 = arith.constant dense<0xFF800000> : vector<8xf32>
    %91 = vector.multi_reduction <maximumf>, %90, %cst_46 [1] : vector<8x8xf32> to vector<8xf32>
    %92 = vector.shape_cast %91 : vector<8xf32> to vector<8x1xf32>
    %93 = vector.broadcast %92 : vector<8x1xf32> to vector<8x8xf32>
    %94 = arith.subf %90, %93 : vector<8x8xf32>
    %95 = math.exp %94 : vector<8x8xf32>
    %cst_47 = arith.constant dense<0.000000e+00> : vector<8xf32>
    %96 = vector.multi_reduction <add>, %95, %cst_47 [1] : vector<8x8xf32> to vector<8xf32>
    %97 = vector.shape_cast %96 : vector<8xf32> to vector<8x1xf32>
    %98 = vector.broadcast %97 : vector<8x1xf32> to vector<8x8xf32>
    %99 = arith.divf %95, %98 : vector<8x8xf32>
    %100 = arith.truncf %99 : vector<8x8xf32> to vector<8x8xbf16>
    %cst_48 = arith.constant dense<0.000000e+00> : vector<8x8xf32>
    %101 = tpu.matmul %100, %85, %cst_48 {dimension_numbers = #tpu.dot_dimension_numbers<[1], [0], [0], [1], [0, 0, 1, 1], [], []>} : vector<8x8xbf16>, vector<8x8xbf16>, vector<8x8xf32> -> vector<8x8xf32>
    %c0_49 = arith.constant 0 : index
    %c16_50 = arith.constant 16 : index
    %102 = vector.load %arg10[%c0_49, %c16_50] : memref<8x32xf32, #tpu.memory_space<vmem>>, vector<8x8xf32>
    tpu.vector_store %arg10[%c0_49, %c16_50], %101 {strides = array<i32>} : memref<8x32xf32, #tpu.memory_space<vmem>>, vector<8x8xf32>,
    %c0_51 = arith.constant 0 : index
    %c24 = arith.constant 24 : index
    %103 = vector.load %arg9[%c0_51, %c24] : memref<8x96xf32, #tpu.memory_space<vmem>>, vector<8x8xf32>
    %104 = arith.truncf %103 : vector<8x8xf32> to vector<8x8xbf16>
    %c0_52 = arith.constant 0 : index
    %c56 = arith.constant 56 : index
    %105 = vector.load %arg9[%c0_52, %c56] : memref<8x96xf32, #tpu.memory_space<vmem>>, vector<8x8xf32>
    %106 = arith.truncf %105 : vector<8x8xf32> to vector<8x8xbf16>
    %c0_53 = arith.constant 0 : index
    %c88 = arith.constant 88 : index
    %107 = vector.load %arg9[%c0_53, %c88] : memref<8x96xf32, #tpu.memory_space<vmem>>, vector<8x8xf32>
    %108 = arith.truncf %107 : vector<8x8xf32> to vector<8x8xbf16>
    %cst_54 = arith.constant dense<0.000000e+00> : vector<8x8xf32>
    %109 = tpu.matmul %104, %106, %cst_54 {dimension_numbers = #tpu.dot_dimension_numbers<[1], [1], [0], [0], [0, 0, 1, 0], [], []>} : vector<8x8xbf16>, vector<8x8xbf16>, vector<8x8xf32> -> vector<8x8xf32>
    %cst_55 = arith.constant 0.353553385 : f32
    %110 = vector.broadcast %cst_55 : f32 to vector<8x8xf32>
    %111 = arith.mulf %109, %110 : vector<8x8xf32>
    %cst_56 = arith.constant -1.000000e+30 : f32
    %112 = vector.broadcast %cst_56 : f32 to vector<8x8xf32>
    %113 = arith.select %33, %111, %112 : vector<8x8xi1>, vector<8x8xf32>
    %cst_57 = arith.constant dense<0xFF800000> : vector<8xf32>
    %114 = vector.multi_reduction <maximumf>, %113, %cst_57 [1] : vector<8x8xf32> to vector<8xf32>
    %115 = vector.shape_cast %114 : vector<8xf32> to vector<8x1xf32>
    %116 = vector.broadcast %115 : vector<8x1xf32> to vector<8x8xf32>
    %117 = arith.subf %113, %116 : vector<8x8xf32>
    %118 = math.exp %117 : vector<8x8xf32>
    %cst_58 = arith.constant dense<0.000000e+00> : vector<8xf32>
    %119 = vector.multi_reduction <add>, %118, %cst_58 [1] : vector<8x8xf32> to vector<8xf32>
    %120 = vector.shape_cast %119 : vector<8xf32> to vector<8x1xf32>
    %121 = vector.broadcast %120 : vector<8x1xf32> to vector<8x8xf32>
    %122 = arith.divf %118, %121 : vector<8x8xf32>
    %123 = arith.truncf %122 : vector<8x8xf32> to vector<8x8xbf16>
    %cst_59 = arith.constant dense<0.000000e+00> : vector<8x8xf32>
    %124 = tpu.matmul %123, %108, %cst_59 {dimension_numbers = #tpu.dot_dimension_numbers<[1], [0], [0], [1], [0, 0, 1, 1], [], []>} : vector<8x8xbf16>, vector<8x8xbf16>, vector<8x8xf32> -> vector<8x8xf32>
    %c0_60 = arith.constant 0 : index
    %c24_61 = arith.constant 24 : index
    %125 = vector.load %arg10[%c0_60, %c24_61] : memref<8x32xf32, #tpu.memory_space<vmem>>, vector<8x8xf32>
    tpu.vector_store %arg10[%c0_60, %c24_61], %124 {strides = array<i32>} : memref<8x32xf32, #tpu.memory_space<vmem>>, vector<8x8xf32>,
    %c0_62 = arith.constant 0 : index
    %c0_63 = arith.constant 0 : index
    %126 = vector.load %arg10[%c0_62, %c0_63] : memref<8x32xf32, #tpu.memory_space<vmem>>, vector<8x32xf32>
    %127 = arith.truncf %126 : vector<8x32xf32> to vector<8x32xbf16>
    %c0_64 = arith.constant 0 : index
    %c0_65 = arith.constant 0 : index
    %128 = vector.load %arg6[%c0_64, %c0_65] : memref<32x32xbf16, #tpu.memory_space<vmem>>, vector<32x32xbf16>
    %cst_66 = arith.constant dense<0.000000e+00> : vector<8x32xf32>
    %129 = tpu.matmul %127, %128, %cst_66 {dimension_numbers = #tpu.dot_dimension_numbers<[1], [0], [0], [1], [0, 0, 1, 1], [], []>} : vector<8x32xbf16>, vector<32x32xbf16>, vector<8x32xf32> -> vector<8x32xf32>
    %c0_67 = arith.constant 0 : index
    %c0_68 = arith.constant 0 : index
    %130 = vector.load %arg7[%c0_67, %c0_68] : memref<1x32xf32, #tpu.memory_space<vmem>>, vector<1x32xf32>
    %131 = vector.broadcast %130 : vector<1x32xf32> to vector<8x32xf32>
    %132 = arith.addf %129, %131 : vector<8x32xf32>
    %133 = arith.addf %1, %132 : vector<8x32xf32>
    %c0_69 = arith.constant 0 : index
    %c0_70 = arith.constant 0 : index
    %c0_71 = arith.constant 0 : index
    %134 = vector.load %arg8[%c0_69, %c0_70, %c0_71] : memref<1x8x32xf32, #tpu.memory_space<vmem>>, vector<1x8x32xf32>
    %135 = vector.shape_cast %134 : vector<1x8x32xf32> to vector<8x32xf32>
    %136 = vector.shape_cast %133 : vector<8x32xf32> to vector<1x8x32xf32>
    tpu.vector_store %arg8[%c0_69, %c0_70, %c0_71], %136 {strides = array<i32>} : memref<1x8x32xf32, #tpu.memory_space<vmem>>, vector<1x8x32xf32>,
    return
  }
  func.func @transform_0(%arg0: i32) -> (i32, i32, i32) {
    %c0_i32 = arith.constant 0 : i32
    %c0_i32_0 = arith.constant 0 : i32
    %c0_i32_1 = arith.constant 0 : i32
    return %arg0, %c0_i32, %c0_i32_0 : i32, i32, i32
  }
  func.func @transform_1(%arg0: i32) -> (i32, i32) {
    %c0_i32 = arith.constant 0 : i32
    %c0_i32_0 = arith.constant 0 : i32
    %c0_i32_1 = arith.constant 0 : i32
    return %c0_i32, %c0_i32_0 : i32, i32
  }
  func.func @transform_2(%arg0: i32) -> (i32, i32) {
    %c0_i32 = arith.constant 0 : i32
    %c0_i32_0 = arith.constant 0 : i32
    %c0_i32_1 = arith.constant 0 : i32
    return %c0_i32, %c0_i32_0 : i32, i32
  }
  func.func @transform_3(%arg0: i32) -> (i32, i32) {
    %c0_i32 = arith.constant 0 : i32
    %c0_i32_0 = arith.constant 0 : i32
    %c0_i32_1 = arith.constant 0 : i32
    return %c0_i32, %c0_i32_0 : i32, i32
  }
  func.func @transform_4(%arg0: i32) -> (i32, i32) {
    %c0_i32 = arith.constant 0 : i32
    %c0_i32_0 = arith.constant 0 : i32
    %c0_i32_1 = arith.constant 0 : i32
    return %c0_i32, %c0_i32_0 : i32, i32
  }
  func.func @transform_5(%arg0: i32) -> (i32, i32) {
    %c0_i32 = arith.constant 0 : i32
    %c0_i32_0 = arith.constant 0 : i32
    %c0_i32_1 = arith.constant 0 : i32
    return %c0_i32, %c0_i32_0 : i32, i32
  }
  func.func @transform_6(%arg0: i32) -> (i32, i32) {
    %c0_i32 = arith.constant 0 : i32
    %c0_i32_0 = arith.constant 0 : i32
    %c0_i32_1 = arith.constant 0 : i32
    return %c0_i32, %c0_i32_0 : i32, i32
  }
  func.func @transform_7(%arg0: i32) -> (i32, i32, i32) {
    %c0_i32 = arith.constant 0 : i32
    %c0_i32_0 = arith.constant 0 : i32
    %c0_i32_1 = arith.constant 0 : i32
    return %arg0, %c0_i32, %c0_i32_0 : i32, i32, i32
  }
}

module attributes {stable_mosaic.version = 11 : i64} {
  func.func @mlp_block_kernel(%arg0: i32, %arg1: memref<16x32xf32, #tpu.memory_space<vmem>>, %arg2: memref<1x32xf32, #tpu.memory_space<vmem>>, %arg3: memref<1x32xf32, #tpu.memory_space<vmem>>, %arg4: memref<32x128xbf16, #tpu.memory_space<vmem>>, %arg5: memref<1x128xf32, #tpu.memory_space<vmem>>, %arg6: memref<128x32xbf16, #tpu.memory_space<vmem>>, %arg7: memref<1x32xf32, #tpu.memory_space<vmem>>, %arg8: memref<16x32xf32, #tpu.memory_space<vmem>>) attributes {dimension_semantics = [#tpu.dimension_semantics<parallel>], iteration_bounds = array<i64: 1>, scalar_prefetch = 0 : i64, scratch_operands = 0 : i64, tpu.core_type = #tpu.core_type<tc>, window_params = [{transform_indices = @transform_0, window_bounds = array<i64: 16, 32>}, {pipeline_mode = #tpu.pipeline_mode<synchronous>, transform_indices = @transform_1, window_bounds = array<i64: 1, 32>}, {pipeline_mode = #tpu.pipeline_mode<synchronous>, transform_indices = @transform_2, window_bounds = array<i64: 1, 32>}, {pipeline_mode = #tpu.pipeline_mode<synchronous>, transform_indices = @transform_3, window_bounds = array<i64: 32, 128>}, {pipeline_mode = #tpu.pipeline_mode<synchronous>, transform_indices = @transform_4, window_bounds = array<i64: 1, 128>}, {pipeline_mode = #tpu.pipeline_mode<synchronous>, transform_indices = @transform_5, window_bounds = array<i64: 128, 32>}, {pipeline_mode = #tpu.pipeline_mode<synchronous>, transform_indices = @transform_6, window_bounds = array<i64: 1, 32>}, {transform_indices = @transform_7, window_bounds = array<i64: 16, 32>}]} {
    %c0 = arith.constant 0 : index
    %c0_0 = arith.constant 0 : index
    %0 = vector.load %arg1[%c0, %c0_0] : memref<16x32xf32, #tpu.memory_space<vmem>>, vector<16x32xf32>
    %c0_1 = arith.constant 0 : index
    %c0_2 = arith.constant 0 : index
    %1 = vector.load %arg2[%c0_1, %c0_2] : memref<1x32xf32, #tpu.memory_space<vmem>>, vector<1x32xf32>
    %c0_3 = arith.constant 0 : index
    %c0_4 = arith.constant 0 : index
    %2 = vector.load %arg3[%c0_3, %c0_4] : memref<1x32xf32, #tpu.memory_space<vmem>>, vector<1x32xf32>
    %cst = arith.constant dense<0.000000e+00> : vector<16xf32>
    %3 = vector.multi_reduction <add>, %0, %cst [1] : vector<16x32xf32> to vector<16xf32>
    %4 = vector.shape_cast %3 : vector<16xf32> to vector<16x1xf32>
    %cst_5 = arith.constant 3.200000e+01 : f32
    %5 = vector.broadcast %cst_5 : f32 to vector<16x1xf32>
    %6 = arith.divf %4, %5 : vector<16x1xf32>
    %7 = vector.broadcast %6 : vector<16x1xf32> to vector<16x32xf32>
    %8 = arith.subf %0, %7 : vector<16x32xf32>
    %9 = arith.mulf %8, %8 : vector<16x32xf32>
    %cst_6 = arith.constant dense<0.000000e+00> : vector<16xf32>
    %10 = vector.multi_reduction <add>, %9, %cst_6 [1] : vector<16x32xf32> to vector<16xf32>
    %11 = vector.shape_cast %10 : vector<16xf32> to vector<16x1xf32>
    %cst_7 = arith.constant 3.200000e+01 : f32
    %12 = vector.broadcast %cst_7 : f32 to vector<16x1xf32>
    %13 = arith.divf %11, %12 : vector<16x1xf32>
    %cst_8 = arith.constant 9.99999974E-6 : f32
    %14 = vector.broadcast %cst_8 : f32 to vector<16x1xf32>
    %15 = arith.addf %13, %14 : vector<16x1xf32>
    %16 = math.rsqrt %15 : vector<16x1xf32>
    %17 = vector.broadcast %16 : vector<16x1xf32> to vector<16x32xf32>
    %18 = arith.mulf %8, %17 : vector<16x32xf32>
    %19 = vector.broadcast %1 : vector<1x32xf32> to vector<16x32xf32>
    %20 = arith.mulf %18, %19 : vector<16x32xf32>
    %21 = vector.broadcast %2 : vector<1x32xf32> to vector<16x32xf32>
    %22 = arith.addf %20, %21 : vector<16x32xf32>
    %23 = arith.truncf %22 : vector<16x32xf32> to vector<16x32xbf16>
    %c0_9 = arith.constant 0 : index
    %c0_10 = arith.constant 0 : index
    %24 = vector.load %arg7[%c0_9, %c0_10] : memref<1x32xf32, #tpu.memory_space<vmem>>, vector<1x32xf32>
    %25 = vector.broadcast %24 : vector<1x32xf32> to vector<16x32xf32>
    %26 = arith.addf %0, %25 : vector<16x32xf32>
    %c0_11 = arith.constant 0 : index
    %c0_12 = arith.constant 0 : index
    %27 = vector.load %arg4[%c0_11, %c0_12] : memref<32x128xbf16, #tpu.memory_space<vmem>>, vector<32x128xbf16>
    %cst_13 = arith.constant dense<0.000000e+00> : vector<16x128xf32>
    %28 = tpu.matmul %23, %27, %cst_13 {dimension_numbers = #tpu.dot_dimension_numbers<[1], [0], [0], [1], [0, 0, 1, 1], [], []>} : vector<16x32xbf16>, vector<32x128xbf16>, vector<16x128xf32> -> vector<16x128xf32>
    %c0_14 = arith.constant 0 : index
    %c0_15 = arith.constant 0 : index
    %29 = vector.load %arg5[%c0_14, %c0_15] : memref<1x128xf32, #tpu.memory_space<vmem>>, vector<1x128xf32>
    %30 = vector.broadcast %29 : vector<1x128xf32> to vector<16x128xf32>
    %31 = arith.addf %28, %30 : vector<16x128xf32>
    %cst_16 = arith.constant 5.000000e-01 : f32
    %32 = vector.broadcast %cst_16 : f32 to vector<16x128xf32>
    %33 = arith.mulf %32, %31 : vector<16x128xf32>
    %cst_17 = arith.constant 0.707106769 : f32
    %34 = vector.broadcast %cst_17 : f32 to vector<16x128xf32>
    %35 = arith.mulf %31, %34 : vector<16x128xf32>
    %36 = math.erf %35 : vector<16x128xf32>
    %cst_18 = arith.constant 1.000000e+00 : f32
    %37 = vector.broadcast %cst_18 : f32 to vector<16x128xf32>
    %38 = arith.addf %37, %36 : vector<16x128xf32>
    %39 = arith.mulf %33, %38 : vector<16x128xf32>
    %40 = arith.truncf %39 : vector<16x128xf32> to vector<16x128xbf16>
    %c0_19 = arith.constant 0 : index
    %c0_20 = arith.constant 0 : index
    %41 = vector.load %arg6[%c0_19, %c0_20] : memref<128x32xbf16, #tpu.memory_space<vmem>>, vector<128x32xbf16>
    %cst_21 = arith.constant dense<0.000000e+00> : vector<16x32xf32>
    %42 = tpu.matmul %40, %41, %cst_21 {dimension_numbers = #tpu.dot_dimension_numbers<[1], [0], [0], [1], [0, 0, 1, 1], [], []>} : vector<16x128xbf16>, vector<128x32xbf16>, vector<16x32xf32> -> vector<16x32xf32>
    %43 = arith.addf %26, %42 : vector<16x32xf32>
    %c0_22 = arith.constant 0 : index
    %c0_23 = arith.constant 0 : index
    %44 = vector.load %arg8[%c0_22, %c0_23] : memref<16x32xf32, #tpu.memory_space<vmem>>, vector<16x32xf32>
    tpu.vector_store %arg8[%c0_22, %c0_23], %43 {strides = array<i32>} : memref<16x32xf32, #tpu.memory_space<vmem>>, vector<16x32xf32>,
    return
  }
  func.func @transform_0(%arg0: i32) -> (i32, i32) {
    %c0_i32 = arith.constant 0 : i32
    %c0_i32_0 = arith.constant 0 : i32
    return %arg0, %c0_i32 : i32, i32
  }
  func.func @transform_1(%arg0: i32) -> (i32, i32) {
    %c0_i32 = arith.constant 0 : i32
    %c0_i32_0 = arith.constant 0 : i32
    %c0_i32_1 = arith.constant 0 : i32
    return %c0_i32, %c0_i32_0 : i32, i32
  }
  func.func @transform_2(%arg0: i32) -> (i32, i32) {
    %c0_i32 = arith.constant 0 : i32
    %c0_i32_0 = arith.constant 0 : i32
    %c0_i32_1 = arith.constant 0 : i32
    return %c0_i32, %c0_i32_0 : i32, i32
  }
  func.func @transform_3(%arg0: i32) -> (i32, i32) {
    %c0_i32 = arith.constant 0 : i32
    %c0_i32_0 = arith.constant 0 : i32
    %c0_i32_1 = arith.constant 0 : i32
    return %c0_i32, %c0_i32_0 : i32, i32
  }
  func.func @transform_4(%arg0: i32) -> (i32, i32) {
    %c0_i32 = arith.constant 0 : i32
    %c0_i32_0 = arith.constant 0 : i32
    %c0_i32_1 = arith.constant 0 : i32
    return %c0_i32, %c0_i32_0 : i32, i32
  }
  func.func @transform_5(%arg0: i32) -> (i32, i32) {
    %c0_i32 = arith.constant 0 : i32
    %c0_i32_0 = arith.constant 0 : i32
    %c0_i32_1 = arith.constant 0 : i32
    return %c0_i32, %c0_i32_0 : i32, i32
  }
  func.func @transform_6(%arg0: i32) -> (i32, i32) {
    %c0_i32 = arith.constant 0 : i32
    %c0_i32_0 = arith.constant 0 : i32
    %c0_i32_1 = arith.constant 0 : i32
    return %c0_i32, %c0_i32_0 : i32, i32
  }
  func.func @transform_7(%arg0: i32) -> (i32, i32) {
    %c0_i32 = arith.constant 0 : i32
    %c0_i32_0 = arith.constant 0 : i32
    return %arg0, %c0_i32 : i32, i32
  }
}

</mosaic_0001>

<bundles_post_ra>
// kernel: block_forward.3
= control target key start
LH: loop header
LB: loop body
LE: loop exit
PB: predicated region body
PF: predicated region fallthrough
CT: control target
= control target key end

     0   :  { %vm32_vm0 = vcmask 261120   ;;  %s513_s0 = inlined_call_operand.vmem [shape: f32[16,32], index: 0, kind: input, shape index: {}]   ;;  %s514_s1 = inlined_call_operand.vmem [shape: f32[1,32], index: 1, kind: input, shape index: {}]   ;;  %s515_s2 = inlined_call_operand.vmem [shape: f32[1,32], index: 2, kind: input, shape index: {}]   ;;  %s516_s3 = inlined_call_operand.vmem [shape: bf16[32,128], index: 3, kind: input, shape index: {}]   ;;  %s517_s4 = inlined_call_operand.vmem [shape: f32[1,128], index: 4, kind: input, shape index: {}]   ;;  %s518_s5 = inlined_call_operand.vmem [shape: bf16[128,32], index: 5, kind: input, shape index: {}]   ;;  %s519_s6 = inlined_call_operand.vmem [shape: f32[1,32], index: 6, kind: input, shape index: {}]   ;;  %s520_s7 = inlined_call_operand.hbm [shape: f32[16,32], index: 7, kind: output, shape index: {}]  }
   0x1   :  { %v439_v0 = vld [vmem:[%s513_s0] sm:$0xff]  ;;  %v444_v1 = vld [vmem:[%s513_s0 + $0x8] sm:$0xff] }
   0x2   :  { %v33_v2 = vsel %vm32_vm0, %v439_v0, 0.0  ;;  %v36_v3 = vsel %vm32_vm0, %v444_v1, 0.0 }
   0x3   :  { %34 = vadd.xlane.f32.xlu0 %v33_v2 }
   0x7   :  { %37 = vadd.xlane.f32.xlu0 %v36_v3 }
   0x8   :  { %12 = vsyncpa [#allocation3], 0  ;;  %v349_v14 = vld [vmem:[%s516_s3] sm:$0xff]   ;;  %v391_v15 = vmov 0.0   ;;  %v350_v16 = vld [vmem:[%s516_s3 + $0x8] sm:$0xff]   ;;  %vm392_vm1 = vmmov 0  }
   0x9   :  { %316 = vmatprep.subr.bf16.mxu0 %v391_v15  ;;  %324 = vmatprep.subr.bf16.mxu1 %v391_v15  ;;  %v351_v17 = vld [vmem:[%s518_s5] sm:$0xff]   ;;  %v352_v18 = vld [vmem:[%s518_s5 + $0x8] sm:$0xff]   ;;  %v353_v36 = vld [vmem:[%s518_s5 + $0x10] sm:$0xff]   ;;  %s393_s27 = smov [#allocation2]  }
   0xa   :  { %317 = vmatpush3.bf16.msra.mxu0 %v349_v14  ;;  %320 = vmatprep.mubr.msk.bf16.mxu0 %vm392_vm1, %v391_v15  ;;  %v289_v27 = vld [vmem:[%s514_s1] ss:$0 sm:$0xff]  ;;  %v354_v37 = vld [vmem:[%s518_s5 + $0x18] sm:$0xff]   ;;  %v356_v39 = vld [vmem:[%s518_s5 + $0x28] sm:$0xff]   ;;  %s278_s0 = sshll.u32 %s393_s27, 4  ;;  %s279_s0 = int_to_ptr.vmem [resolvable:$true] %s278_s0 }
   0xb   :  { %318 = vmatprep.subr.bf16.mxu0 %v391_v15  ;;  %340 = vmatprep.mubr.msk.bf16.mxu1 %vm392_vm1, %v391_v15  ;;  %v290_v31 = vld [vmem:[%s515_s2] ss:$0 sm:$0xff]  ;;  %v357_v40 = vld [vmem:[%s518_s5 + $0x30] sm:$0xff]   ;;  %v358_v41 = vld [vmem:[%s518_s5 + $0x38] sm:$0xff]   ;;  %s367_s28 = scalar_lea.vmem %s279_s0, 256  ;;  %p372_p1 = scmp.lt.s32.totalorder %s279_s0, %s279_s0 }
   0xc   :  { %325 = vmatpush3.bf16.msra.mxu1 %v351_v17  ;;  %v355_v38 = vld [vmem:[%s518_s5 + $0x20] sm:$0xff]   ;;  %p368_p0 = scmp.ne.s32.totalorder %s279_s0, %s367_s28  ;;  %p373_p2 = scmp.lt.s32.totalorder %s367_s28, %s367_s28 }
   0xd   :  { %326 = vmatprep.subr.bf16.mxu1 %v391_v15  ;;  %v292_v42 = vld [vmem:[%s517_s4] ss:$0 sm:$0xff] }
   0xe   :  { %319 = vmatpush3.bf16.msra.mxu0 %v350_v16  ;;  %v291_v60 = vld [vmem:[%s519_s6] ss:$0 sm:$0xff]  ;;  %p374_p3 = por %p373_p2, %p372_p1 }
   0xf   :  { %v84_v61 = vadd.f32 %v291_v60, %v439_v0  ;;  %v85_v62 = vadd.f32 %v291_v60, %v444_v1 }
  0x10   :  { %327 = vmatpush3.bf16.msra.mxu1 %v352_v18  ;;  %p375_p4 = pnand %p374_p3, %p368_p0 }
  0x11   :  { %328 = vmatprep.subr.bf16.mxu1 %v391_v15 }
  0x14   :  { %329 = vmatpush3.bf16.msra.mxu1 %v353_v36 }
  0x15   :  { %330 = vmatprep.subr.bf16.mxu1 %v391_v15 }
  0x18   :  { %331 = vmatpush3.bf16.msra.mxu1 %v354_v37 }
  0x19   :  { %332 = vmatprep.subr.bf16.mxu1 %v391_v15 }
  0x1c   :  { %333 = vmatpush3.bf16.msra.mxu1 %v355_v38 }
  0x1d   :  { %334 = vmatprep.subr.bf16.mxu1 %v391_v15 }
  0x20   :  { %335 = vmatpush3.bf16.msra.mxu1 %v356_v39 }
  0x21   :  { %336 = vmatprep.subr.bf16.mxu1 %v391_v15 }
  0x24   :  { %337 = vmatpush3.bf16.msra.mxu1 %v357_v40 }
  0x25   :  { %338 = vmatprep.subr.bf16.mxu1 %v391_v15 }
  0x28   :  { %339 = vmatpush3.bf16.msra.mxu1 %v358_v41 }
  0x90   :  { %v35_v4 = vpop.xlane.xlu0 %34 }
  0x91   :  { %v40_v5 = vmul.f32 0.03125, %v35_v4 }
  0x93   :  { %v42_v6 = vsub.f32 %v439_v0, %v40_v5 }
  0x94   :  { %v38_v7 = vpop.xlane.xlu0 %37 }
  0x95   :  { %v41_v8 = vmul.f32 0.03125, %v38_v7  ;;  %v44_v9 = vmul.f32 %v42_v6, %v42_v6 }
  0x97   :  { %v43_v10 = vsub.f32 %v444_v1, %v41_v8  ;;  %v46_v11 = vsel %vm32_vm0, %v44_v9, 0.0 }
  0x98   :  { %47 = vadd.xlane.f32.xlu1 %v46_v11 }
  0x99   :  { %v45_v12 = vmul.f32 %v43_v10, %v43_v10 }
  0x9b   :  { %v49_v13 = vsel %vm32_vm0, %v45_v12, 0.0 }
  0x9c   :  { %50 = vadd.xlane.f32.xlu1 %v49_v13 }
 0x125   :  { %v48_v19 = vpop.xlane.xlu1 %47 }
 0x126   :  { %v52_v20 = vmul.f32 0.03125, %v48_v19 }
 0x128   :  { %v54_v21 = vadd.f32 1e-05, %v52_v20 }
 0x129   :  { %v51_v22 = vpop.xlane.xlu1 %50 }
 0x12a   :  { %359 = vrsqrt.f32 %v54_v21  ;;  %v53_v23 = vmul.f32 0.03125, %v51_v22 }
 0x12c   :  { %v55_v24 = vadd.f32 1e-05, %v53_v23 }
 0x12e   :  { %361 = vrsqrt.f32 %v55_v24 }
 0x134   :  { %v360_v25 = vpop.eup %359 }
 0x135   :  { %v58_v26 = vmul.f32 %v360_v25, %v42_v6 }
 0x137   :  { %v66_v30 = vmul.f32 %v289_v27, %v58_v26 }
 0x138   :  { %v362_v28 = vpop.eup %361 }
 0x139   :  { %v59_v29 = vmul.f32 %v362_v28, %v43_v10  ;;  %v74_v33 = vadd.f32 %v290_v31, %v66_v30 }
 0x13b   :  { %v67_v32 = vmul.f32 %v289_v27, %v59_v29 }
 0x13d   :  { %v75_v34 = vadd.f32 %v290_v31, %v67_v32 }
 0x13f   :  { %v76_v35 = vpack.c.bf16 %v75_v34, %v74_v33 }
 0x141   :  { %321 = vmatmul.mubr.msk.bf16.vlgmr.msra.gmra.mrb[0].mxu0 %vm32_vm0, %v76_v35 }
 0x214   :  { %v146_v43 = vpop.f32.mrb[0].mxu0 }
 0x215   :  { %v147_v44 = vadd.f32 %v292_v42, %v146_v43  ;;  %v322_v45 = vpop.f32.mrb[1].mxu0 }
 0x216   :  { %v149_v46 = vpop.f32.mrb[2].mxu0 }
 0x217   :  { %v155_v47 = vmul.f32 0.70710677, %v147_v44  ;;  %v150_v48 = vadd.f32 %v292_v42, %v149_v46  ;;  %v323_v49 = vpop.f32.mrb[3].mxu0  ;;  %v153_v54 = vmul.f32 0.5, %v147_v44 }
 0x219   :  { %363 = verf.f32 %v155_v47  ;;  %v156_v50 = vmul.f32 0.70710677, %v150_v48  ;;  %v154_v55 = vmul.f32 0.5, %v150_v48 }
 0x21b   :  { %365 = verf.f32 %v156_v50 }
 0x223   :  { %v364_v51 = vpop.eup %363 }
 0x224   :  { %v159_v52 = vadd.f32 1.0, %v364_v51 }
 0x225   :  { %v366_v53 = vpop.eup %365 }
 0x226   :  { %v160_v56 = vadd.f32 1.0, %v366_v53  ;;  %v161_v57 = vmul.f32 %v159_v52, %v153_v54 }
 0x228   :  { %v162_v58 = vmul.f32 %v160_v56, %v154_v55 }
 0x22a   :  { %v163_v59 = vpack.c.bf16 %v162_v58, %v161_v57 }
 0x22c   :  { %341 = vmatmul.mubr.bf16.vlgmr.msra.gmra.mrb[0].mxu1 %v163_v59 }
 0x2ff   :  { %v262_v63 = vpop.f32.mrb[0].mxu1 }
 0x300   :  { %v269_v2 = vadd.f32 %v262_v63, %v84_v61  ;;  %v342_v3 = vpop.f32.mrb[1].mxu1 }
 0x301   :  { %v265_v4 = vpop.f32.mrb[2].mxu1 }
 0x302   :  { %271 = vst.msk [vmem:[#allocation2] sm:$0xff] %vm32_vm0, %v269_v2  ;;  %v270_v5 = vadd.f32 %v265_v4, %v85_v62  ;;  %v343_v6 = vpop.f32.mrb[3].mxu1 }
 0x304   :  { %272 = vst.msk [vmem:[#allocation2 + $0x8] sm:$0xff] %vm32_vm0, %v270_v5 }
 0x305   :  { %378 = shalt.err (!%p375_p4)
}
 0x306   :  { %s379_s30 = scalar_lea.hbm %s520_s7, 256 }
 0x307   :  { %p380_p5 = scmp.ne.s32.totalorder %s520_s7, %s379_s30  ;;  %p383_p6 = scmp.lt.u32.totalorder %s379_s30, %s520_s7 }
 0x309   :  { %p385_p7 = pnand %p383_p6, %p380_p5 }
 0x30b   :  { %388 = shalt.err (!%p385_p7)
}
 0x30c   :  { %s394_s3 = smov 128   ;;  %s395_s12 = smov 8  }
 0x30d   :  { %284 = dma.vmem_to_hbm [thread:$0]  %s279_s0, 256, %s520_s7, [#allocation3], %s394_s3, %s394_s3, %s395_s12  }
 0x30e   :  { %389 = dma.done.wait [#allocation3], 256  }
 0x30f   :  { %390 = vsyncadd [#allocation3], 4294967040 }
 0x310   :  { %288 = vsyncpa [#allocation3], 1 }

// kernel: block_forward.2
= control target key start
LH: loop header
LB: loop body
LE: loop exit
PB: predicated region body
PF: predicated region fallthrough
CT: control target
= control target key end

     0   :  { %s1206_s24 = smov 0   ;;  %s1339_s0 = inlined_call_operand.vmem [shape: f32[2,8,32], index: 0, kind: input, shape index: {}]   ;;  %s1340_s1 = inlined_call_operand.vmem [shape: f32[1,32], index: 1, kind: input, shape index: {}]   ;;  %s1341_s2 = inlined_call_operand.vmem [shape: f32[1,32], index: 2, kind: input, shape index: {}]   ;;  %s1342_s3 = inlined_call_operand.vmem [shape: bf16[32,96], index: 3, kind: input, shape index: {}]   ;;  %s1343_s4 = inlined_call_operand.vmem [shape: f32[1,96], index: 4, kind: input, shape index: {}]   ;;  %s1344_s5 = inlined_call_operand.vmem [shape: bf16[32,32], index: 5, kind: input, shape index: {}]   ;;  %s1345_s6 = inlined_call_operand.vmem [shape: f32[1,32], index: 6, kind: input, shape index: {}]   ;;  %s1346_s7 = inlined_call_operand.vmem [shape: f32[2,8,32], index: 7, kind: output, shape index: {}]  }
   0x1 LB: > { %s983_s25 = sadd.s32 4294967295, %s1148_s24   ;;  %p987_p0 = scmp.ge.s32.totalorder %s1148_s24, 1  ;;  %s1148_s24 = sphi %s1206_s24, %s17_s24  }
   0x2   : > { %p236_p1 = scmp.lt.s32.totalorder %s1148_s24, 3 }
   0x4   : > { %p237_p2 = pnand %p987_p0, %p236_p1 }
   0x5   : > { %p266_p3 = scmp.lt.s32.totalorder (!%p237_p2), %s983_s25, 1  ;;  %vm278_vm0 = vcmask (!%p237_p2), 261120   ;;  %v1120_v7 = vld [vmem:[%s1342_s3] sm:$0xff] (!%p237_p2)   ;;  %v1150_v8 = vmov (!%p237_p2), 0.0   ;;  %vm1151_vm1 = vmmov (!%p237_p2), 0   ;;  %v1121_v9 = vld [vmem:[%s1342_s3 + $0x8] sm:$0xff] (!%p237_p2)   ;;  %v376_v39 = vlaneseq (!%p237_p2) }
   0x6   : > { %240 = sbr.rel (%p237_p2) target bundleno = 1825 (0x721), region = 48  ;;  %1032 = vmatprep.subr.bf16.mxu0 (!%p237_p2), %v1150_v8  ;;  %1036 = vmatprep.mubr.msk.bf16.mxu0 (!%p237_p2), %vm1151_vm1, %v1150_v8  ;;  %v990_v14 = vld [vmem:[%s1340_s1] ss:$0 sm:$0xff] (!%p237_p2)  ;;  %vm374_vm2 = vcmask (!%p237_p2), 785408   ;;  %s1152_s17 = smov (!%p237_p2), 120   ;;  %vm386_vm3 = vcmask (!%p237_p2), 64512  }
   0x7   : > { %1033 = vmatpush3.bf16.msra.mxu0 (!%p237_p2), %v1120_v7  ;;  %1040 = vmatprep.subr.bf16.mxu1 (!%p237_p2), %v1150_v8  ;;  %v991_v16 = vld [vmem:[%s1341_s2] ss:$0 sm:$0xff] (!%p237_p2)  ;;  %s1153_s18 = smov (!%p237_p2), 96   ;;  %s1154_s19 = smov (!%p237_p2), 88   ;;  %v377_v40 = vshrl.u32 (!%p237_p2), %v376_v39, 7  ;;  %v379_v41 = vand.u32 (!%p237_p2), 127, %v376_v39 }
   0x8   : > { %1034 = vmatprep.subr.bf16.mxu0 (!%p237_p2), %v1150_v8  ;;  %1042 = vmatprep.mubr.msk.bf16.mxu1 (!%p237_p2), %vm1151_vm1, %v1150_v8  ;;  %v992_v20 = vld [vmem:[%s1343_s4] ss:$0 sm:$0xff] (!%p237_p2)  ;;  %s1155_s20 = smov (!%p237_p2), 80   ;;  %s1156_s21 = smov (!%p237_p2), 112   ;;  %vm452_vm5 = vcmask (!%p237_p2), 1043456   ;;  %vm616_vm6 = vcmask (!%p237_p2), 130112  }
   0x9   : > { %s1157_s22 = smov (!%p237_p2), 72   ;;  %s1158_s23 = smov (!%p237_p2), 104   ;;  %vm380_vm4 = vcmp.le.s32.totalorder (!%p237_p2), %v379_v41, %v377_v40  ;;  %vm737_vm7 = vcmask (!%p237_p2), 195712   ;;  %vm858_vm8 = vcmask (!%p237_p2), 261312  }
   0xa   : > { %s1159_s27 = smov (!%p237_p2), 64   ;;  %s1160_s28 = smov (!%p237_p2), 56  }
   0xb   : > { %1035 = vmatpush3.bf16.msra.mxu0 (!%p237_p2), %v1121_v9  ;;  %s1162_s30 = smov (!%p237_p2), 40   ;;  %s1163_s8 = smov (!%p237_p2), 8  }
   0xc   : > { %1046 = vmatprep.subr.bf16.mxu0 (!%p237_p2), %v1150_v8  ;;  %s1164_s13 = smov (!%p237_p2), 16   ;;  %s1165_s14 = smov (!%p237_p2), 24  }
   0xd   : > { %s1348_s25 = smov (!%p266_p3, %s983_s25), 1 }
   0xe   : > { %s988_s26 = sshll.u32 %s1348_s25, 3 }
   0xf   : > { %s269_s29 = scalar_lea.vmem %s1339_s0, %s988_s26 }
  0x10   : > { %v1222_v0 = vld [vmem:[%s269_s29] sm:$0xff]  ;;  %s1161_s29 = smov 48  }
  0x11   : > { %v279_v1 = vsel %vm278_vm0, %v1222_v0, 0.0 }
  0x12   : > { %280 = vadd.xlane.f32.xlu0 %v279_v1 }
  0x9f   : > { %v281_v2 = vpop.xlane.xlu0 %280 }
  0xa0   : > { %v283_v3 = vmul.f32 0.03125, %v281_v2 }
  0xa2   : > { %v284_v4 = vsub.f32 %v1222_v0, %v283_v3 }
  0xa4   : > { %v285_v5 = vmul.f32 %v284_v4, %v284_v4 }
  0xa6   : > { %v286_v6 = vsel %vm278_vm0, %v285_v5, 0.0 }
  0xa7   : > { %287 = vadd.xlane.f32.xlu0 %v286_v6 }
 0x134   : > { %v288_v10 = vpop.xlane.xlu0 %287 }
 0x135   : > { %v289_v11 = vmul.f32 0.03125, %v288_v10 }
 0x137   : > { %v290_v12 = vadd.f32 1e-05, %v289_v11 }
 0x139   : > { %1124 = vrsqrt.f32 %v290_v12 }
 0x143   : > { %v1125_v13 = vpop.eup %1124 }
 0x144   : > { %v292_v15 = vmul.f32 %v1125_v13, %v284_v4 }
 0x146   : > { %v299_v17 = vmul.f32 %v990_v14, %v292_v15 }
 0x148   : > { %v306_v18 = vadd.f32 %v991_v16, %v299_v17 }
 0x14a   : > { %v307_v19 = vpack.c.bf16 %v306_v18, %v306_v18 }
 0x14c   : > { %1037 = vmatmul.mubr.msk.bf16.vlgmr.msra.gmra.mrb[0].mxu0 %vm278_vm0, %v307_v19 }
 0x14d   : > { %1048 = vmatprep.mubr.msk.bf16.mxu0 %vm1151_vm1, %v1150_v8 }
 0x21f   : > { %v368_v21 = vpop.f32.mrb[0].mxu0 }
 0x220   : > { %v369_v22 = vadd.f32 %v992_v20, %v368_v21  ;;  %v1038_v23 = vpop.f32.mrb[1].mxu0 }
 0x221   : > { %v371_v24 = vpop.f32.mrb[2].mxu0 }
 0x222   : > { %375 = vst.msk [vmem:[#allocation2] sm:$0xff] %vm374_vm2, %v369_v22  ;;  %v1039_v25 = vpop.f32.mrb[3].mxu0 }
 0x229   : > { %v497_v26 = vld [vmem:[#allocation2] sm:$0xff] }
 0x22a   : > { %v1254_v27 = vpack.c.bf16 %v497_v26, %v497_v26 }
 0x22c   : > { %500 = vrot.lane.b32.xlu0 %v1254_v27, %s1152_s17  ;;  %384 = vrot.lane.b32.xlu1 %v1254_v27, %s1153_s18 }
 0x230   : > { %502 = vrot.lane.b32.xlu1 %v1254_v27, %s1154_s19  ;;  %s273_s19 = scalar_lea.vmem %s1346_s7, %s988_s26 }
 0x234   : > { %623 = vrot.lane.b32.xlu1 %v1254_v27, %s1155_s20 }
 0x238   : > { %621 = vrot.lane.b32.xlu1 %v1254_v27, %s1156_s21 }
 0x23c   : > { %744 = vrot.lane.b32.xlu1 %v1254_v27, %s1157_s22 }
 0x240   : > { %742 = vrot.lane.b32.xlu1 %v1254_v27, %s1158_s23 }
 0x29e   : > { %v385_v28 = vpop.permute.xlu1 %384  ;;  %v501_v33 = vpop.permute.xlu0 %500 }
 0x29f   : > { %v391_v29 = vsel %vm386_vm3, %v385_v28, 0 }
 0x2a0   : > { %1041 = vmatpush3.bf16.xpose.msra.mxu1 %v391_v29 }
 0x2a1   : > { %1052 = vmatprep.subr.bf16.mxu1 %v1150_v8 }
 0x2a2   : > { %v503_v30 = vpop.permute.xlu1 %502 }
 0x2a3   : > { %v508_v31 = vsel %vm386_vm3, %v503_v30, 0 }
 0x2a6   : > { %v624_v32 = vpop.permute.xlu1 %623 }
 0x2a7   : > { %1043 = vmatmul.mubr.msk.bf16.vlgmr.msra.gmra.mrb[0].mxu1 %vm386_vm3, %v1254_v27  ;;  %v629_v35 = vsel %vm386_vm3, %v624_v32, 0 }
 0x2a8   : > { %1053 = vmatpush3.bf16.xpose.msra.mxu1 %v508_v31  ;;  %1054 = vmatprep.mubr.msk.bf16.mxu1 %vm1151_vm1, %v1150_v8 }
 0x2a9   : > { %1064 = vmatprep.subr.bf16.mxu1 %v1150_v8 }
 0x2aa   : > { %v622_v34 = vpop.permute.xlu1 %621 }
 0x2ae   : > { %v745_v36 = vpop.permute.xlu1 %744 }
 0x2af   : > { %1055 = vmatmul.mubr.msk.bf16.vlgmr.msra.gmra.mrb[4].mxu1 %vm386_vm3, %v501_v33  ;;  %v750_v37 = vsel %vm386_vm3, %v745_v36, 0 }
 0x2b0   : > { %1065 = vmatpush3.bf16.xpose.msra.mxu1 %v629_v35  ;;  %1066 = vmatprep.mubr.msk.bf16.mxu1 %vm1151_vm1, %v1150_v8 }
 0x2b1   : > { %1076 = vmatprep.subr.bf16.mxu1 %v1150_v8 }
 0x2b2   : > { %v743_v38 = vpop.permute.xlu1 %742 }
 0x2b7   : > { %1067 = vmatmul.mubr.msk.bf16.vlgmr.msra.gmra.mrb[8].mxu1 %vm386_vm3, %v622_v34 }
 0x2b8   : > { %1077 = vmatpush3.bf16.xpose.msra.mxu1 %v750_v37  ;;  %1078 = vmatprep.mubr.msk.bf16.mxu1 %vm1151_vm1, %v1150_v8 }
 0x2b9   : > { %1088 = vmatprep.subr.bf16.mxu1 %v1150_v8 }
 0x2bf   : > { %1079 = vmatmul.mubr.msk.bf16.vlgmr.msra.gmra.mrb[12].mxu1 %vm386_vm3, %v743_v38 }
 0x2c0   : > { %1092 = vmatprep.mubr.msk.bf16.mxu1 %vm1151_vm1, %v1150_v8 }
 0x37a   : > { %v427_v42 = vpop.f32.mrb[0].mxu1 }
 0x37b   : > { %v433_v43 = vmul.f32 0.35355338, %v427_v42  ;;  %v1044_v44 = vpop.f32.mrb[1].mxu1 }
 0x37c   : > { %v430_v45 = vpop.f32.mrb[2].mxu1 }
 0x37d   : > { %v1045_v46 = vpop.f32.mrb[3].mxu1  ;;  %v434_v47 = vsel %vm380_vm4, %v433_v43, -1e+30 }
 0x37e   : > { %v435_v48 = vsel %vm386_vm3, %v434_v47, -inf }
 0x37f   : > { %436 = vmax.xlane.f32.xlu1 %v435_v48 }
 0x382   : > { %v544_v49 = vpop.f32.mrb[4].mxu1 }
 0x383   : > { %v550_v50 = vmul.f32 0.35355338, %v544_v49  ;;  %v1056_v51 = vpop.f32.mrb[5].mxu1 }
 0x384   : > { %v547_v52 = vpop.f32.mrb[6].mxu1 }
 0x385   : > { %v1057_v53 = vpop.f32.mrb[7].mxu1  ;;  %v551_v54 = vsel %vm380_vm4, %v550_v50, -1e+30 }
 0x386   : > { %v552_v55 = vsel %vm386_vm3, %v551_v54, -inf }
 0x387   : > { %553 = vmax.xlane.f32.xlu0 %v552_v55 }
 0x38a   : > { %v665_v56 = vpop.f32.mrb[8].mxu1 }
 0x38b   : > { %v671_v57 = vmul.f32 0.35355338, %v665_v56  ;;  %v1068_v58 = vpop.f32.mrb[9].mxu1 }
 0x38c   : > { %v668_v59 = vpop.f32.mrb[10].mxu1 }
 0x38d   : > { %v1069_v60 = vpop.f32.mrb[11].mxu1  ;;  %v672_v61 = vsel %vm380_vm4, %v671_v57, -1e+30 }
 0x38e   : > { %v673_v62 = vsel %vm386_vm3, %v672_v61, -inf  ;;  %v1122_v60 = vld [vmem:[%s1344_s5] sm:$0xff]  }
 0x38f   : > { %674 = vmax.xlane.f32.xlu1 %v673_v62  ;;  %1089 = vmatpush3.bf16.msra.mxu1 %v1122_v60 }
 0x390   : > { %1090 = vmatprep.subr.bf16.mxu1 %v1150_v8 }
 0x392   : > { %v786_v63 = vpop.f32.mrb[12].mxu1 }
 0x393   : > { %v792_v1 = vmul.f32 0.35355338, %v786_v63  ;;  %v1080_v2 = vpop.f32.mrb[13].mxu1 }
 0x394   : > { %v789_v3 = vpop.f32.mrb[14].mxu1 }
 0x395   : > { %v1081_v4 = vpop.f32.mrb[15].mxu1  ;;  %v793_v5 = vsel %vm380_vm4, %v792_v1, -1e+30 }
 0x396   : > { %v794_v6 = vsel %vm386_vm3, %v793_v5, -inf }
 0x397   : > { %795 = vmax.xlane.f32.xlu0 %v794_v6 }
 0x40c   : > { %v437_v7 = vpop.xlane.xlu1 %436 }
 0x40d   : > { %v438_v9 = vsub.f32 %v434_v47, %v437_v7 }
 0x40f   : > { %v439_v10 = vmul.f32 1.442695, %v438_v9 }
 0x411   : > { %1126 = vpow2.f32 %v439_v10 }
 0x414   : > { %v554_v11 = vpop.xlane.xlu0 %553 }
 0x415   : > { %v555_v12 = vsub.f32 %v551_v54, %v554_v11 }
 0x417   : > { %v556_v13 = vmul.f32 1.442695, %v555_v12  ;;  %v1004_v12 = vld [vmem:[%s1345_s6] ss:$0 sm:$0xff] }
 0x419   : > { %1128 = vpow2.f32 %v556_v13 }
 0x41b   : > { %v1127_v14 = vpop.eup %1126 }
 0x41c   : > { %v441_v15 = vsel %vm386_vm3, %v1127_v14, 0.0  ;;  %v675_v23 = vpop.xlane.xlu1 %674 }
 0x41d   : > { %442 = vadd.xlane.f32.xlu1 %v441_v15  ;;  %v676_v24 = vsub.f32 %v672_v61, %v675_v23  ;;  %v1123_v61 = vld [vmem:[%s1344_s5 + $0x8] sm:$0xff]  }
 0x41e   : > { %1091 = vmatpush3.bf16.msra.mxu1 %v1123_v61 }
 0x41f   : > { %v677_v25 = vmul.f32 1.442695, %v676_v24 }
 0x423   : > { %v1129_v16 = vpop.eup %1128 }
 0x424   : > { %v796_v17 = vpop.xlane.xlu0 %795  ;;  %v558_v18 = vsel %vm386_vm3, %v1129_v16, 0.0 }
 0x425   : > { %v797_v19 = vsub.f32 %v793_v5, %v796_v17  ;;  %559 = vadd.xlane.f32.xlu0 %v558_v18 }
 0x427   : > { %v798_v20 = vmul.f32 1.442695, %v797_v19 }
 0x429   : > { %1130 = vpow2.f32 %v798_v20 }
 0x42a   : > { %1132 = vpow2.f32 %v677_v25 }
 0x42e   : > { %447 = vrot.lane.b32.xlu1 %v1254_v27, %s1159_s27 }
 0x433   : > { %v1131_v21 = vpop.eup %1130 }
 0x434   : > { %v800_v22 = vsel %vm386_vm3, %v1131_v21, 0.0  ;;  %v1133_v26 = vpop.eup %1132 }
 0x435   : > { %801 = vadd.xlane.f32.xlu0 %v800_v22  ;;  %v679_v28 = vsel %vm386_vm3, %v1133_v26, 0.0 }
 0x44b   : > { %564 = vrot.lane.b32.xlu0 %v1254_v27, %s1160_s28 }
 0x452   : > { %680 = vadd.xlane.f32.xlu1 %v679_v28 }
 0x463   : > { %685 = vrot.lane.b32.xlu1 %v1254_v27, %s1161_s29 }
 0x467   : > { %806 = vrot.lane.b32.xlu1 %v1254_v27, %s1162_s30 }
 0x4aa   : > { %v443_v29 = vpop.xlane.xlu1 %442 }
 0x4ab   : > { %1134 = vrcp.f32 %v443_v29 }
 0x4ae   : > { %v448_v30 = vpop.permute.xlu1 %447 }
 0x4af   : > { %v454_v31 = vsel %vm452_vm5, %v448_v30, 0 }
 0x4b0   : > { %1047 = vmatpush3.bf16.msra.mxu0 %v454_v31 }
 0x4b1   : > { %1058 = vmatprep.subr.bf16.mxu0 %v1150_v8 }
 0x4b2   : > { %v560_v33 = vpop.xlane.xlu0 %559 }
 0x4b3   : > { %1136 = vrcp.f32 %v560_v33 }
 0x4b5   : > { %v1135_v32 = vpop.eup %1134 }
 0x4b6   : > { %v445_v34 = vmul.f32 %v1135_v32, %v1127_v14 }
 0x4b8   : > { %v446_v35 = vpack.c.bf16 %v445_v34, %v445_v34 }
 0x4ba   : > { %1049 = vmatmul.mubr.msk.bf16.vlgmr.msra.gmra.mrb[4].mxu0 %vm386_vm3, %v446_v35 }
 0x4bb   : > { %1060 = vmatprep.mubr.msk.bf16.mxu0 %vm1151_vm1, %v1150_v8 }
 0x4bd   : > { %v1137_v27 = vpop.eup %1136 }
 0x4be   : > { %v562_v37 = vmul.f32 %v1137_v27, %v1129_v16 }
 0x4c0   : > { %v563_v40 = vpack.c.bf16 %v562_v37, %v562_v37 }
 0x4c2   : > { %v802_v36 = vpop.xlane.xlu0 %801 }
 0x4c6   : > { %v565_v38 = vpop.permute.xlu0 %564 }
 0x4c7   : > { %v570_v39 = vsel %vm452_vm5, %v565_v38, 0 }
 0x4c8   : > { %1059 = vmatpush3.bf16.msra.mxu0 %v570_v39 }
 0x4c9   : > { %1070 = vmatprep.subr.bf16.mxu0 %v1150_v8 }
 0x4cb   : > { %1061 = vmatmul.mubr.msk.bf16.vlgmr.msra.gmra.mrb[8].mxu0 %vm386_vm3, %v563_v40 }
 0x4cc   : > { %1072 = vmatprep.mubr.msk.bf16.mxu0 %vm1151_vm1, %v1150_v8 }
 0x4df   : > { %v681_v41 = vpop.xlane.xlu1 %680 }
 0x4e0   : > { %1138 = vrcp.f32 %v681_v41 }
 0x4e1   : > { %1140 = vrcp.f32 %v802_v36 }
 0x4e3   : > { %v686_v42 = vpop.permute.xlu1 %685 }
 0x4e4   : > { %v691_v43 = vsel %vm452_vm5, %v686_v42, 0 }
 0x4e5   : > { %1071 = vmatpush3.bf16.msra.mxu0 %v691_v43 }
 0x4e6   : > { %1082 = vmatprep.subr.bf16.mxu0 %v1150_v8 }
 0x4e7   : > { %v807_v46 = vpop.permute.xlu1 %806 }
 0x4e8   : > { %v812_v49 = vsel %vm452_vm5, %v807_v46, 0 }
 0x4ea   : > { %v1139_v44 = vpop.eup %1138 }
 0x4eb   : > { %v683_v45 = vmul.f32 %v1139_v44, %v1133_v26  ;;  %v1141_v48 = vpop.eup %1140 }
 0x4ec   : > { %v804_v50 = vmul.f32 %v1141_v48, %v1131_v21 }
 0x4ed   : > { %v684_v47 = vpack.c.bf16 %v683_v45, %v683_v45 }
 0x4ee   : > { %v805_v51 = vpack.c.bf16 %v804_v50, %v804_v50 }
 0x4ef   : > { %1073 = vmatmul.mubr.msk.bf16.vlgmr.msra.gmra.mrb[12].mxu0 %vm386_vm3, %v684_v47 }
 0x4f0   : > { %1083 = vmatpush3.bf16.msra.mxu0 %v812_v49  ;;  %1084 = vmatprep.mubr.msk.bf16.mxu0 %vm1151_vm1, %v1150_v8 }
 0x4f7   : > { %1085 = vmatmul.mubr.msk.bf16.vlgmr.msra.gmra.mrb[16].mxu0 %vm386_vm3, %v805_v51 }
 0x58d   : > { %v490_v52 = vpop.f32.mrb[4].mxu0 }
 0x58e   : > { %496 = vst.msk [vmem:[#allocation3] sm:$0xff] %vm386_vm3, %v490_v52  ;;  %v1050_v53 = vpop.f32.mrb[5].mxu0 }
 0x58f   : > { %v493_v54 = vpop.f32.mrb[6].mxu0 }
 0x590   : > { %v1051_v55 = vpop.f32.mrb[7].mxu0 }
 0x59e   : > { %v606_v56 = vpop.f32.mrb[8].mxu0 }
 0x59f   : > { %613 = vrot.lane.b32.xlu0 %v606_v56, %s1163_s8  ;;  %v1062_v57 = vpop.f32.mrb[9].mxu0 }
 0x5a0   : > { %v609_v58 = vpop.f32.mrb[10].mxu0 }
 0x5a1   : > { %v1063_v59 = vpop.f32.mrb[11].mxu0 }
 0x5c2   : > { %v727_v62 = vpop.f32.mrb[12].mxu0 }
 0x5c3   : > { %734 = vrot.lane.b32.xlu1 %v727_v62, %s1164_s13  ;;  %v1074_v63 = vpop.f32.mrb[13].mxu0 }
 0x5c4   : > { %v730_v1 = vpop.f32.mrb[14].mxu0 }
 0x5c5   : > { %v1075_v2 = vpop.f32.mrb[15].mxu0 }
 0x5ca   : > { %v848_v3 = vpop.f32.mrb[16].mxu0 }
 0x5cb   : > { %855 = vrot.lane.b32.xlu0 %v848_v3, %s1165_s14  ;;  %v1086_v4 = vpop.f32.mrb[17].mxu0 }
 0x5cc   : > { %v851_v5 = vpop.f32.mrb[18].mxu0 }
 0x5cd   : > { %v1087_v6 = vpop.f32.mrb[19].mxu0 }
 0x611   : > { %v614_v7 = vpop.permute.xlu0 %613 }
 0x612   : > { %617 = vst.msk [vmem:[#allocation3] sm:$0xff] %vm616_vm6, %v614_v7 }
 0x635   : > { %v735_v9 = vpop.permute.xlu1 %734 }
 0x636   : > { %738 = vst.msk [vmem:[#allocation3] sm:$0xff] %vm737_vm7, %v735_v9 }
 0x63d   : > { %v856_v8 = vpop.permute.xlu0 %855 }
 0x63e   : > { %859 = vst.msk [vmem:[#allocation3] sm:$0xff] %vm858_vm8, %v856_v8 }
 0x645   : > { %v860_v10 = vld [vmem:[#allocation3] sm:$0xff] }
 0x646   : > { %v861_v11 = vpack.c.bf16 %v860_v10, %v860_v10 }
 0x648   : > { %1093 = vmatmul.mubr.msk.bf16.vlgmr.msra.gmra.mrb[16].mxu1 %vm278_vm0, %v861_v11 }
 0x71b   : > { %v922_v13 = vpop.f32.mrb[16].mxu1 }
 0x71c   : > { %v923_v14 = vadd.f32 %v1004_v12, %v922_v13  ;;  %v1094_v15 = vpop.f32.mrb[17].mxu1 }
 0x71d   : > { %v925_v16 = vpop.f32.mrb[18].mxu1 }
 0x71e   : > { %v928_v17 = vadd.f32 %v923_v14, %v1222_v0  ;;  %v1095_v18 = vpop.f32.mrb[19].mxu1 }
 0x720   : > { %929 = vst.msk [vmem:[%s273_s19] sm:$0xff] %vm278_vm0, %v928_v17 }
 0x721 PF: > { %s17_s24 = sadd.s32 1, %s1148_s24  }
 0x722   : > { %p14_p4 = scmp.ge.s32.totalorder %s17_s24, 4  }
 0x724   :  { %16 = sbr.rel (!%p14_p4) target bundleno = 1 (0x1), region = 78 }

</bundles_post_ra>
